<compile_context>
chip_gen: v7x
topology: tpu7x:2x2x1
jax: 0.10.0
libtpu: 0.0.40
codegen_flags: <defaults>
</compile_context>

<pallas_src>
import math
import functools

import jax
import jax.numpy as jnp
from jax import lax
from jax.experimental import pallas as pl
from jax.experimental.pallas import tpu as pltpu

_NORM_EPS = 1e-12  # F.normalize default eps


def _pick_tile_n(num_classes):
    # Prefer big lane-dense class tiles, but keep >= 2 grid steps so the
    # "parallel" grid axis can be sharded across both TensorCores on v7x.
    for t in (512, 256, 128):
        if num_classes % t == 0 and num_classes // t >= 2:
            return t
    if num_classes % 128 == 0:
        return 128
    return num_classes  # full-extent block (always legal)


def _arc_margin_kernel(label_ref, xn_ref, w_ref, out_ref, *,
                       cos_m, sin_m, th, mm, s, easy_margin, tile_n):
    j = pl.program_id(0)

    # x is already row-normalized (and cast to bf16) in the wrapper.
    xn = xn_ref[...]                                    # (B, E) bf16
    w = w_ref[...].astype(jnp.float32)                  # (tile_n, E) f32

    # Row L2-normalize the W class tile with an EUP rsqrt.
    # max(sqrt(ss), eps) == sqrt(max(ss, eps^2)), so this matches F.normalize.
    w_ss = jnp.sum(w * w, axis=-1, keepdims=True)
    wn = (w * lax.rsqrt(jnp.maximum(w_ss, _NORM_EPS * _NORM_EPS))
          ).astype(jnp.bfloat16)

    # cosine = xn @ wn^T, contracting on the embedding axis of both operands.
    # No transpose is materialized; accumulation is in float32 on the MXU.
    cosine = lax.dot_general(
        xn, wn,
        dimension_numbers=(((1,), (1,)), ((), ())),
        preferred_element_type=jnp.float32)             # (B, tile_n) f32

    # one_hot over this class tile: class id = j * tile_n + lane index.
    b = cosine.shape[0]
    class_ids = j * tile_n + lax.broadcasted_iota(jnp.int32, (b, tile_n), 1)
    one_hot = label_ref[...] == class_ids               # (B, tile_n) bool

    # Gather the label-column cosine per row (zero if the label falls outside
    # this class tile) and do the margin math on just (B, 1) values.
    cos_lbl = jnp.sum(jnp.where(one_hot, cosine, 0.0), axis=-1, keepdims=True)
    sin_lbl = jnp.sqrt(jnp.clip(1.0 - cos_lbl * cos_lbl, 0.0, 1.0))
    phi_lbl = cos_lbl * cos_m - sin_lbl * sin_m
    if easy_margin:
        phi_lbl = jnp.where(cos_lbl > 0.0, phi_lbl, cos_lbl)
    else:
        phi_lbl = jnp.where(cos_lbl > th, phi_lbl, cos_lbl - mm)
    delta = phi_lbl - cos_lbl                           # (B, 1) f32

    # output = (cosine + one_hot * (phi - cosine)) * s
    out = (cosine + jnp.where(one_hot, delta, 0.0)) * s
    out_ref[...] = out.astype(out_ref.dtype)


def arc_margin_forward(x, weight, label, *, margin_m=0.5, margin_s=64.0,
                       easy_margin=False, tile_n=None, out_dtype=jnp.float32):
    """ArcFace margin forward.

    x: (B, E) float, weight: (C, E) float (f32 or bf16), label: (B,) int.
    Returns (B, C) logits in `out_dtype`.
    """
    B, E = x.shape
    C, E2 = weight.shape
    assert E == E2

    # Pad the class dim to a multiple of 128 so the output stores stay
    # lane-dense (unmasked vst). Padded rows of W are all-zero -> cosine 0,
    # and are sliced off below; labels never point at them.
    C_pad = C
    if C % 128 != 0:
        C_pad = ((C + 127) // 128) * 128
        weight = jnp.pad(weight, ((0, C_pad - C), (0, 0)))

    if tile_n is None:
        tile_n = _pick_tile_n(C_pad)
    assert C_pad % tile_n == 0

    cos_m = math.cos(margin_m)
    sin_m = math.sin(margin_m)
    th = math.cos(math.pi - margin_m)
    mm = math.sin(math.pi - margin_m) * margin_m

    # Hoist the x row-normalization out of the class-tile loop; cast the
    # matmul operand to bf16 (the MXU fast path on all generations).
    xf = x.astype(jnp.float32)
    x_ss = jnp.sum(xf * xf, axis=-1, keepdims=True)
    x_norm = (xf * lax.rsqrt(jnp.maximum(x_ss, _NORM_EPS * _NORM_EPS))
              ).astype(jnp.bfloat16)

    # TODO(synk): label stays as a (B,1) int32 VMEM block (lane-padded) rather
    # than SMEM scalar-prefetch, because the one-hot compare needs it as a
    # vector; the padding cost is negligible at these sizes.
    label2d = label.astype(jnp.int32).reshape(B, 1)

    kernel = functools.partial(
        _arc_margin_kernel,
        cos_m=cos_m, sin_m=sin_m, th=th, mm=mm, s=margin_s,
        easy_margin=easy_margin, tile_n=tile_n)

    out = pl.pallas_call(
        kernel,
        out_shape=jax.ShapeDtypeStruct((B, C_pad), out_dtype),
        grid_spec=pltpu.PrefetchScalarGridSpec(
            num_scalar_prefetch=0,
            grid=(C_pad // tile_n,),
            in_specs=[
                pl.BlockSpec((B, 1), lambda j: (0, 0)),        # label (B,1)
                pl.BlockSpec((B, E), lambda j: (0, 0)),        # x_norm (bf16)
                pl.BlockSpec((tile_n, E), lambda j: (j, 0)),   # W class tile
            ],
            out_specs=pl.BlockSpec((B, tile_n), lambda j: (0, j)),
        ),
        compiler_params=pltpu.CompilerParams(
            dimension_semantics=("parallel",)),
    )(label2d, x_norm, weight)

    if C_pad != C:
        out = out[:, :C]
    return out


def _reference(x, weight, label, *, margin_m=0.5, margin_s=64.0,
               easy_margin=False):
    cos_m = math.cos(margin_m); sin_m = math.sin(margin_m)
    th = math.cos(math.pi - margin_m)
    mm = math.sin(math.pi - margin_m) * margin_m
    xn = x / jnp.maximum(jnp.linalg.norm(x, axis=-1, keepdims=True), _NORM_EPS)
    wn = weight / jnp.maximum(jnp.linalg.norm(weight, axis=-1, keepdims=True),
                              _NORM_EPS)
    cosine = xn @ wn.T
    sine = jnp.sqrt(jnp.clip(1.0 - cosine ** 2, 0.0, 1.0))
    phi = cosine * cos_m - sine * sin_m
    phi = jnp.where(cosine > 0, phi, cosine) if easy_margin \
        else jnp.where(cosine > th, phi, cosine - mm)
    one_hot = jax.nn.one_hot(label, cosine.shape[1], dtype=cosine.dtype)
    return (one_hot * phi + (1.0 - one_hot) * cosine) * margin_s


if __name__ == "__main__":
    # Small, deterministic shapes consistent with the module:
    #   batch=8, emb_size=32, num_classes=256
    B, E, C = 8, 32, 256
    key = jax.random.PRNGKey(0)
    kx, kw, kl = jax.random.split(key, 3)

    x = jax.random.normal(kx, (B, E), dtype=jnp.float32)

    # Deterministic xavier_uniform init for weight (num_classes, emb_size).
    bound = math.sqrt(6.0 / (C + E))
    weight = jax.random.uniform(kw, (C, E), minval=-bound, maxval=bound,
                                dtype=jnp.float32)

    label = jax.random.randint(kl, (B,), 0, C, dtype=jnp.int32)

    out = arc_margin_forward(x, weight, label,
                             margin_m=0.5, margin_s=64.0, easy_margin=False)
    out = jax.block_until_ready(out)

    ref = _reference(x, weight, label, margin_m=0.5, margin_s=64.0,
                     easy_margin=False)
    assert out.shape == (B, C)
    # bf16 MXU operands: bound on the cosine error is ~4e-3, i.e. ~0.26 after
    # the s=64 scaling -> loosened absolute tolerance vs. the f32 reference.
    assert jnp.allclose(out, ref, atol=0.3, rtol=0.0)

    print("KERNEL_OK")
</pallas_src>

<mosaic_0001>
module attributes {stable_mosaic.version = 11 : i64} {
  func.func @_arc_margin_kernel(%arg0: i32, %arg1: memref<8x1xi32, #tpu.memory_space<vmem>>, %arg2: memref<8x32xbf16, #tpu.memory_space<vmem>>, %arg3: memref<128x32xf32, #tpu.memory_space<vmem>>, %arg4: memref<8x128xf32, #tpu.memory_space<vmem>>) attributes {dimension_semantics = [#tpu.dimension_semantics<parallel>], iteration_bounds = array<i64: 2>, scalar_prefetch = 0 : i64, scratch_operands = 0 : i64, tpu.core_type = #tpu.core_type<tc>, window_params = [{pipeline_mode = #tpu.pipeline_mode<synchronous>, transform_indices = @transform_0, window_bounds = array<i64: 8, 1>}, {pipeline_mode = #tpu.pipeline_mode<synchronous>, transform_indices = @transform_1, window_bounds = array<i64: 8, 32>}, {transform_indices = @transform_2, window_bounds = array<i64: 128, 32>}, {transform_indices = @transform_3, window_bounds = array<i64: 8, 128>}]} {
    %c0 = arith.constant 0 : index
    %c0_0 = arith.constant 0 : index
    %0 = vector.load %arg2[%c0, %c0_0] : memref<8x32xbf16, #tpu.memory_space<vmem>>, vector<8x32xbf16>
    %c0_1 = arith.constant 0 : index
    %c0_2 = arith.constant 0 : index
    %1 = vector.load %arg3[%c0_1, %c0_2] : memref<128x32xf32, #tpu.memory_space<vmem>>, vector<128x32xf32>
    %2 = arith.mulf %1, %1 : vector<128x32xf32>
    %cst = arith.constant dense<0.000000e+00> : vector<128xf32>
    %3 = vector.multi_reduction <add>, %2, %cst [1] : vector<128x32xf32> to vector<128xf32>
    %4 = vector.shape_cast %3 : vector<128xf32> to vector<128x1xf32>
    %cst_3 = arith.constant 1.000000e-24 : f32
    %5 = vector.broadcast %cst_3 : f32 to vector<128x1xf32>
    %6 = arith.maximumf %4, %5 : vector<128x1xf32>
    %7 = math.rsqrt %6 : vector<128x1xf32>
    %8 = vector.broadcast %7 : vector<128x1xf32> to vector<128x32xf32>
    %9 = arith.mulf %1, %8 : vector<128x32xf32>
    %10 = arith.truncf %9 : vector<128x32xf32> to vector<128x32xbf16>
    %cst_4 = arith.constant dense<0.000000e+00> : vector<8x128xf32>
    %11 = tpu.matmul %0, %10, %cst_4 {dimension_numbers = #tpu.dot_dimension_numbers<[1], [1], [0], [0], [0, 0, 1, 0], [], []>} : vector<8x32xbf16>, vector<128x32xbf16>, vector<8x128xf32> -> vector<8x128xf32>
    %c128_i32 = arith.constant 128 : i32
    %12 = arith.muli %arg0, %c128_i32 : i32
    %13 = tpu.iota {dimensions = array<i32: 1>} : vector<8x128xi32>
    %14 = vector.broadcast %12 : i32 to vector<8x128xi32>
    %15 = arith.addi %14, %13 : vector<8x128xi32>
    %c0_5 = arith.constant 0 : index
    %c0_6 = arith.constant 0 : index
    %16 = vector.load %arg1[%c0_5, %c0_6] : memref<8x1xi32, #tpu.memory_space<vmem>>, vector<8x1xi32>
    %17 = vector.broadcast %16 : vector<8x1xi32> to vector<8x128xi32>
    %18 = arith.cmpi eq, %17, %15 : vector<8x128xi32>
    %cst_7 = arith.constant 0.000000e+00 : f32
    %19 = vector.broadcast %cst_7 : f32 to vector<8x128xf32>
    %20 = arith.select %18, %11, %19 : vector<8x128xi1>, vector<8x128xf32>
    %cst_8 = arith.constant dense<0.000000e+00> : vector<8xf32>
    %21 = vector.multi_reduction <add>, %20, %cst_8 [1] : vector<8x128xf32> to vector<8xf32>
    %22 = vector.shape_cast %21 : vector<8xf32> to vector<8x1xf32>
    %23 = arith.mulf %22, %22 : vector<8x1xf32>
    %cst_9 = arith.constant 1.000000e+00 : f32
    %24 = vector.broadcast %cst_9 : f32 to vector<8x1xf32>
    %25 = arith.subf %24, %23 : vector<8x1xf32>
    %cst_10 = arith.constant 0.000000e+00 : f32
    %cst_11 = arith.constant 1.000000e+00 : f32
    %26 = vector.broadcast %cst_10 : f32 to vector<8x1xf32>
    %27 = arith.maximumf %26, %25 : vector<8x1xf32>
    %28 = vector.broadcast %cst_11 : f32 to vector<8x1xf32>
    %29 = arith.minimumf %28, %27 : vector<8x1xf32>
    %30 = math.sqrt %29 : vector<8x1xf32>
    %cst_12 = arith.constant 0.87758255 : f32
    %31 = vector.broadcast %cst_12 : f32 to vector<8x1xf32>
    %32 = arith.mulf %22, %31 : vector<8x1xf32>
    %cst_13 = arith.constant 0.47942555 : f32
    %33 = vector.broadcast %cst_13 : f32 to vector<8x1xf32>
    %34 = arith.mulf %30, %33 : vector<8x1xf32>
    %35 = arith.subf %32, %34 : vector<8x1xf32>
    %cst_14 = arith.constant -0.87758255 : f32
    %36 = vector.broadcast %cst_14 : f32 to vector<8x1xf32>
    %37 = arith.cmpf ogt, %22, %36 : vector<8x1xf32>
    %cst_15 = arith.constant 0.239712775 : f32
    %38 = vector.broadcast %cst_15 : f32 to vector<8x1xf32>
    %39 = arith.subf %22, %38 : vector<8x1xf32>
    %40 = arith.select %37, %35, %39 : vector<8x1xi1>, vector<8x1xf32>
    %41 = arith.subf %40, %22 : vector<8x1xf32>
    %cst_16 = arith.constant 0.000000e+00 : f32
    %42 = vector.shape_cast %41 : vector<8x1xf32> to vector<8x1xf32>
    %43 = vector.broadcast %42 : vector<8x1xf32> to vector<8x128xf32>
    %44 = vector.broadcast %cst_16 : f32 to vector<8x128xf32>
    %45 = arith.select %18, %43, %44 : vector<8x128xi1>, vector<8x128xf32>
    %46 = arith.addf %11, %45 : vector<8x128xf32>
    %cst_17 = arith.constant 6.400000e+01 : f32
    %47 = vector.broadcast %cst_17 : f32 to vector<8x128xf32>
    %48 = arith.mulf %46, %47 : vector<8x128xf32>
    %c0_18 = arith.constant 0 : index
    %c0_19 = arith.constant 0 : index
    %49 = vector.load %arg4[%c0_18, %c0_19] : memref<8x128xf32, #tpu.memory_space<vmem>>, vector<8x128xf32>
    tpu.vector_store %arg4[%c0_18, %c0_19], %48 {strides = array<i32>} : memref<8x128xf32, #tpu.memory_space<vmem>>, vector<8x128xf32>,
    return
  }
  func.func @transform_0(%arg0: i32) -> (i32, i32) {
    %c0_i32 = arith.constant 0 : i32
    %c0_i32_0 = arith.constant 0 : i32
    %c0_i32_1 = arith.constant 0 : i32
    return %c0_i32, %c0_i32_0 : i32, i32
  }
  func.func @transform_1(%arg0: i32) -> (i32, i32) {
    %c0_i32 = arith.constant 0 : i32
    %c0_i32_0 = arith.constant 0 : i32
    %c0_i32_1 = arith.constant 0 : i32
    return %c0_i32, %c0_i32_0 : i32, i32
  }
  func.func @transform_2(%arg0: i32) -> (i32, i32) {
    %c0_i32 = arith.constant 0 : i32
    %c0_i32_0 = arith.constant 0 : i32
    return %arg0, %c0_i32 : i32, i32
  }
  func.func @transform_3(%arg0: i32) -> (i32, i32) {
    %c0_i32 = arith.constant 0 : i32
    %c0_i32_0 = arith.constant 0 : i32
    return %c0_i32, %arg0 : i32, i32
  }
}

</mosaic_0001>

<bundles_post_ra>
// kernel: tpu_custom_call.1
= control target key start
LH: loop header
LB: loop body
LE: loop exit
PB: predicated region body
PF: predicated region fallthrough
CT: control target
= control target key end

     0   :  { %8 = vsyncpa [#allocation3], 0  ;;  %s936_s0 = inlined_call_operand.vmem [shape: s32[8,1], index: 0, kind: input, shape index: {}]   ;;  %s937_s1 = inlined_call_operand.vmem [shape: bf16[8,32], index: 1, kind: input, shape index: {}]   ;;  %s938_s2 = inlined_call_operand.vmem [shape: f32[256,32], index: 2, kind: input, shape index: {}]   ;;  %s939_s3 = inlined_call_operand.hbm [shape: f32[8,256], index: 3, kind: output, shape index: {}]  }
   0x1   :  { %10 = vsyncpa [#allocation3 + $0x1], 0  ;;  %s693_s12 = smov 0   ;;  %s695_s13 = smov 0  }
   0x2   :  { %s697_s14 = smov 0   ;;  %s699_s15 = smov 0  }
   0x3 LB: > { %s714_s16 = sadd.s32 4294967295, %s667_s15   ;;  %s485_s17 = sadd.s32 4294967294, %s667_s15   ;;  %s667_s15 = sphi %s699_s15, %s945_s15   ;;  %s663_s14 = sphi %s697_s14, %s944_s14   ;;  %s659_s13 = sphi %s695_s13, %s943_s13   ;;  %s655_s12 = sphi %s693_s12, %s942_s12  }
   0x4   : > { %s718_s18 = sadd.s32 1, %s667_s15   ;;  %s91_s19 = sadd.s32 1, %s663_s14 }
   0x5   : > { %s88_s20 = ssub.s32 %s667_s15, %s718_s18  ;;  %p101_p0 = scmp.ne.s32.totalorder %s663_s14, %s659_s13 }
   0x6   : > { %p89_p1 = scmp.eq.s32.totalorder %s88_s20, 0  ;;  %p102_p2 = scmp.eq.s32.totalorder %s714_s16, 1 }
   0x7   : > { %p107_p3 = scmp.ne.s32.totalorder %s659_s13, %s655_s12  ;;  %p108_p4 = scmp.eq.s32.totalorder %s485_s17, 1 }
   0x8   : > { %s729_s21 = scalar_select %p89_p1, %s663_s14, %s91_s19  }
   0x9   : > { %p731_p5 = por %p102_p2, %p101_p0  ;;  %p735_p6 = por %p108_p4, %p107_p3 }
   0xa   : > { %p488_p7 = scmp.ge.s32.totalorder %s667_s15, 1  ;;  %p141_p8 = scmp.lt.s32.totalorder %s667_s15, 3 }
   0xc   : > { %p142_p9 = pnand %p488_p7, %p141_p8 }
   0xd   : > { %s490_s24 = sshll.u32 (!%p142_p9), %s714_s16, 4  ;;  %vm205_vm0 = vcmask (!%p142_p9), 261120   ;;  %v669_v48 = vmov (!%p142_p9), 0.0   ;;  %vm670_vm1 = vmmov (!%p142_p9), 0   ;;  %v382_v49 = vld [vmem:[%s936_s0] sm:$0xff] (!%p142_p9)  ;;  %v671_v50 = vmov (!%p142_p9), 0  }
   0xe   : > { %145 = sbr.rel (%p142_p9) target bundleno = 659 (0x293), region = 32  ;;  %p166_p10 = scmp.lt.s32.totalorder (!%p142_p9), %s490_s24, 31  ;;  %508 = vmatprep.subr.bf16.mxu0 (!%p142_p9), %v669_v48  ;;  %524 = vmatprep.mubr.msk.bf16.mxu0 (!%p142_p9), %vm670_vm1, %v669_v48 }
   0xf   : > { %570 = vset.pattern.permute.xlu0 (!%p142_p9), %v671_v50  ;;  %s493_s6 = sshll.u32 (!%p142_p9), %s714_s16, 7  ;;  %s162_s7 = sand.u32 (!%p142_p9), 1, %s659_s13  }
  0x10   : > { %s489_s8 = sshll.u32 (!%p142_p9), %s162_s7, 3  ;;  %s894_s19 = scalar_lea.hbm (!%p142_p9), %s939_s3, %s493_s6 }
  0x11   : > { %s164_s9 = scalar_lea.vmem (!%p142_p9), [#allocation2], %s489_s8  ;;  %s413_s20 = scalar_lea.sflag (!%p142_p9), [#allocation3], %s162_s7 }
  0x12   : > { %s426_s10 = sshll.u32 (!%p142_p9), %s164_s9, 4  ;;  %s896_s10 = int_to_ptr.vmem [resolvable:$true] %s426_s10 }
  0x15   : > { %s947_s24 = smov (!%p166_p10, %s490_s24), 31 }
  0x16   : > { %s491_s25 = sshll.u32 %s947_s24, 3  ;;  %s605_s24 = scalar_lea.vmem %s896_s10, 128 }
  0x17   : > { %s745_s28 = scalar_lea.vmem %s938_s2, %s491_s25  ;;  %p606_p11 = scmp.ne.s32.totalorder %s896_s10, %s605_s24 }
  0x18   : > { %v748_v0 = vld [vmem:[%s745_s28] sm:$0xff]  ;;  %v751_v1 = vld [vmem:[%s745_s28 + $0x10] sm:$0xff]  ;;  %v754_v2 = vld [vmem:[%s745_s28 + $0x8] sm:$0xff]  ;;  %s672_s25 = smov [#allocation2]  }
  0x19   : > { %v189_v3 = vmul.f32 %v748_v0, %v748_v0  ;;  %v191_v4 = vmul.f32 %v751_v1, %v751_v1  ;;  %v190_v5 = vmul.f32 %v754_v2, %v754_v2  ;;  %v763_v6 = vld [vmem:[%s745_s28 + $0x18] sm:$0xff]  ;;  %v768_v8 = vld [vmem:[%s745_s28 + $0x28] sm:$0xff]  ;;  %v771_v9 = vld [vmem:[%s745_s28 + $0x20] sm:$0xff]  ;;  %p607_p12 = pnand %p606_p11, %p731_p5  ;;  %s609_s26 = sshll.u32 %s672_s25, 4  ;;  %s610_s26 = int_to_ptr.vmem [resolvable:$false] %s609_s26 }
  0x1a   : > { %v192_v7 = vmul.f32 %v763_v6, %v763_v6  ;;  %v194_v14 = vmul.f32 %v768_v8, %v768_v8  ;;  %v193_v15 = vmul.f32 %v771_v9, %v771_v9  ;;  %v782_v16 = vld [vmem:[%s745_s28 + $0x38] sm:$0xff]  ;;  %v785_v17 = vld [vmem:[%s745_s28 + $0x30] sm:$0xff]  ;;  %v794_v22 = vld [vmem:[%s745_s28 + $0x48] sm:$0xff]  ;;  %s611_s16 = scalar_lea.vmem %s610_s26, 256  ;;  %p612_p0 = scmp.lt.s32.totalorder %s896_s10, %s610_s26 }
  0x1b   : > { %v206_v10 = vsel %vm205_vm0, %v189_v3, 0.0  ;;  %v212_v11 = vsel %vm205_vm0, %v191_v4, 0.0  ;;  %v209_v12 = vsel %vm205_vm0, %v190_v5, 0.0  ;;  %v196_v20 = vmul.f32 %v782_v16, %v782_v16  ;;  %v797_v23 = vld [vmem:[%s745_s28 + $0x40] sm:$0xff]  ;;  %v806_v28 = vld [vmem:[%s745_s28 + $0x58] sm:$0xff]  ;;  %v809_v29 = vld [vmem:[%s745_s28 + $0x50] sm:$0xff]  ;;  %p608_p13 = pneg %p607_p12  ;;  %p613_p1 = scmp.lt.s32.totalorder %s611_s16, %s605_s24 }
  0x1c   : > { %207 = vadd.xlane.f32.xlu0 %v206_v10  ;;  %213 = vadd.xlane.f32.xlu1 %v212_v11  ;;  %v215_v13 = vsel %vm205_vm0, %v192_v7, 0.0  ;;  %v221_v18 = vsel %vm205_vm0, %v194_v14, 0.0  ;;  %v218_v19 = vsel %vm205_vm0, %v193_v15, 0.0  ;;  %v195_v21 = vmul.f32 %v785_v17, %v785_v17  ;;  %v818_v34 = vld [vmem:[%s745_s28 + $0x68] sm:$0xff]  ;;  %v821_v35 = vld [vmem:[%s745_s28 + $0x60] sm:$0xff]  ;;  %v830_v40 = vld [vmem:[%s745_s28 + $0x78] sm:$0xff] }
  0x1d   : > { %v227_v24 = vsel %vm205_vm0, %v196_v20, 0.0  ;;  %v198_v26 = vmul.f32 %v794_v22, %v794_v22  ;;  %v197_v27 = vmul.f32 %v797_v23, %v797_v23  ;;  %v200_v32 = vmul.f32 %v806_v28, %v806_v28  ;;  %v833_v41 = vld [vmem:[%s745_s28 + $0x70] sm:$0xff]  ;;  %p614_p2 = por %p613_p1, %p612_p0 }
  0x1e   : > { %v224_v25 = vsel %vm205_vm0, %v195_v21, 0.0  ;;  %v199_v33 = vmul.f32 %v809_v29, %v809_v29  ;;  %v202_v38 = vmul.f32 %v818_v34, %v818_v34  ;;  %v201_v39 = vmul.f32 %v821_v35, %v821_v35 }
  0x1f   : > { %v233_v30 = vsel %vm205_vm0, %v198_v26, 0.0  ;;  %v230_v31 = vsel %vm205_vm0, %v197_v27, 0.0  ;;  %v239_v36 = vsel %vm205_vm0, %v200_v32, 0.0  ;;  %v204_v44 = vmul.f32 %v830_v40, %v830_v40  ;;  %p615_p3 = pnand %p614_p2, %p608_p13 }
  0x20   : > { %210 = vadd.xlane.f32.xlu0 %v209_v12  ;;  %216 = vadd.xlane.f32.xlu1 %v215_v13  ;;  %v236_v37 = vsel %vm205_vm0, %v199_v33, 0.0  ;;  %v245_v42 = vsel %vm205_vm0, %v202_v38, 0.0  ;;  %v242_v43 = vsel %vm205_vm0, %v201_v39, 0.0  ;;  %v203_v45 = vmul.f32 %v833_v41, %v833_v41 }
  0x21   : > { %v251_v46 = vsel %vm205_vm0, %v204_v44, 0.0 }
  0x22   : > { %v248_v47 = vsel %vm205_vm0, %v203_v45, 0.0 }
  0x24   : > { %222 = vadd.xlane.f32.xlu1 %v221_v18  ;;  %219 = vadd.xlane.f32.xlu0 %v218_v19 }
  0x28   : > { %228 = vadd.xlane.f32.xlu1 %v227_v24  ;;  %225 = vadd.xlane.f32.xlu0 %v224_v25 }
  0x2c   : > { %234 = vadd.xlane.f32.xlu1 %v233_v30  ;;  %231 = vadd.xlane.f32.xlu0 %v230_v31 }
  0x30   : > { %240 = vadd.xlane.f32.xlu1 %v239_v36  ;;  %237 = vadd.xlane.f32.xlu0 %v236_v37 }
  0x34   : > { %246 = vadd.xlane.f32.xlu1 %v245_v42  ;;  %243 = vadd.xlane.f32.xlu0 %v242_v43 }
  0x38   : > { %252 = vadd.xlane.f32.xlu1 %v251_v46  ;;  %249 = vadd.xlane.f32.xlu0 %v248_v47 }
  0x4e   : > { %384 = vperm.xlu0 %570, %v382_v49  }
  0xa9   : > { %v208_v51 = vpop.xlane.xlu0 %207  ;;  %v214_v52 = vpop.xlane.xlu1 %213 }
  0xaa   : > { %v254_v53 = vmax.f32 %v208_v51, 1e-24  ;;  %v256_v54 = vmax.f32 %v214_v52, 1e-24 }
  0xac   : > { %571 = vrsqrt.f32 %v254_v53 }
  0xad   : > { %v211_v55 = vpop.xlane.xlu0 %210  ;;  %v217_v56 = vpop.xlane.xlu1 %216 }
  0xae   : > { %v255_v57 = vmax.f32 %v211_v55, 1e-24  ;;  %v257_v58 = vmax.f32 %v217_v56, 1e-24 }
  0xb0   : > { %573 = vrsqrt.f32 %v255_v57 }
  0xb1   : > { %575 = vrsqrt.f32 %v256_v54  ;;  %v223_v59 = vpop.xlane.xlu1 %222  ;;  %v220_v60 = vpop.xlane.xlu0 %219 }
  0xb2   : > { %577 = vrsqrt.f32 %v257_v58  ;;  %v259_v61 = vmax.f32 %v223_v59, 1e-24  ;;  %v258_v62 = vmax.f32 %v220_v60, 1e-24 }
  0xb4   : > { %579 = vrsqrt.f32 %v259_v61 }
  0xb5   : > { %581 = vrsqrt.f32 %v258_v62  ;;  %v229_v3 = vpop.xlane.xlu1 %228  ;;  %v226_v4 = vpop.xlane.xlu0 %225 }
  0xb6   : > { %v572_v63 = vpop.eup %571  ;;  %v261_v12 = vmax.f32 %v229_v3, 1e-24  ;;  %v260_v14 = vmax.f32 %v226_v4, 1e-24 }
  0xb7   : > { %v286_v10 = vmul.f32 %v572_v63, %v748_v0 }
  0xb8   : > { %583 = vrsqrt.f32 %v261_v12  ;;  %v172_v12 = vld [vmem:[%s937_s1] sm:$0xf] }
  0xb9   : > { %585 = vrsqrt.f32 %v260_v14  ;;  %v235_v21 = vpop.xlane.xlu1 %234  ;;  %v232_v0 = vpop.xlane.xlu0 %231 }
  0xba   : > { %v574_v5 = vpop.eup %573  ;;  %v263_v26 = vmax.f32 %v235_v21, 1e-24  ;;  %v262_v27 = vmax.f32 %v232_v0, 1e-24 }
  0xbb   : > { %v576_v7 = vpop.eup %575  ;;  %v287_v11 = vmul.f32 %v574_v5, %v754_v2 }
  0xbc   : > { %v578_v13 = vpop.eup %577  ;;  %v288_v19 = vmul.f32 %v576_v7, %v751_v1  ;;  %587 = vrsqrt.f32 %v263_v26 }
  0xbd   : > { %v302_v15 = vpack.c.bf16 %v287_v11, %v286_v10  ;;  %v289_v20 = vmul.f32 %v578_v13, %v763_v6  ;;  %589 = vrsqrt.f32 %v262_v27  ;;  %v241_v1 = vpop.xlane.xlu1 %240  ;;  %v238_v36 = vpop.xlane.xlu0 %237  ;;  %v378_v13 = vlaneseq }
  0xbe   : > { %v580_v24 = vpop.eup %579  ;;  %v265_v38 = vmax.f32 %v241_v1, 1e-24  ;;  %v264_v39 = vmax.f32 %v238_v36, 1e-24 }
  0xbf   : > { %v314_v18 = vsel %vm205_vm0, %v302_v15, 0  ;;  %v582_v25 = vpop.eup %581  ;;  %v303_v2 = vpack.c.bf16 %v289_v20, %v288_v19  ;;  %v291_v31 = vmul.f32 %v580_v24, %v768_v8  ;;  %v379_v14 = vand.u32 127, %v378_v13 }
  0xc0   : > { %509 = vmatpush3.bf16.xpose.msra.mxu0 %v314_v18  ;;  %v290_v30 = vmul.f32 %v582_v25, %v771_v9  ;;  %591 = vrsqrt.f32 %v265_v38 }
  0xc1   : > { %510 = vmatprep.subr.bf16.mxu0 %v669_v48  ;;  %v317_v32 = vsel %vm205_vm0, %v303_v2, 0  ;;  %593 = vrsqrt.f32 %v264_v39  ;;  %v247_v43 = vpop.xlane.xlu1 %246  ;;  %v244_v46 = vpop.xlane.xlu0 %243 }
  0xc2   : > { %v584_v6 = vpop.eup %583  ;;  %v304_v33 = vpack.c.bf16 %v291_v31, %v290_v30  ;;  %v267_v49 = vmax.f32 %v247_v43, 1e-24  ;;  %v266_v50 = vmax.f32 %v244_v46, 1e-24 }
  0xc3   : > { %v586_v37 = vpop.eup %585  ;;  %v293_v8 = vmul.f32 %v584_v6, %v782_v16 }
  0xc4   : > { %v320_v42 = vsel %vm205_vm0, %v304_v33, 0  ;;  %v292_v9 = vmul.f32 %v586_v37, %v785_v17  ;;  %595 = vrsqrt.f32 %v267_v49 }
  0xc5   : > { %597 = vrsqrt.f32 %v266_v50  ;;  %v253_v16 = vpop.xlane.xlu1 %252  ;;  %v250_v55 = vpop.xlane.xlu0 %249 }
  0xc6   : > { %v588_v44 = vpop.eup %587  ;;  %v305_v45 = vpack.c.bf16 %v293_v8, %v292_v9  ;;  %v269_v57 = vmax.f32 %v253_v16, 1e-24  ;;  %v268_v58 = vmax.f32 %v250_v55, 1e-24 }
  0xc7   : > { %v590_v47 = vpop.eup %589  ;;  %v295_v17 = vmul.f32 %v588_v44, %v794_v22 }
  0xc8   : > { %511 = vmatpush3.bf16.xpose.msra.mxu0 %v317_v32  ;;  %v323_v51 = vsel %vm205_vm0, %v305_v45, 0  ;;  %v294_v52 = vmul.f32 %v590_v47, %v797_v23  ;;  %599 = vrsqrt.f32 %v269_v57 }
  0xc9   : > { %512 = vmatprep.subr.bf16.mxu0 %v669_v48  ;;  %601 = vrsqrt.f32 %v268_v58 }
  0xca   : > { %v592_v53 = vpop.eup %591  ;;  %v306_v54 = vpack.c.bf16 %v295_v17, %v294_v52 }
  0xcb   : > { %v594_v56 = vpop.eup %593  ;;  %v297_v23 = vmul.f32 %v592_v53, %v806_v28 }
  0xcc   : > { %v326_v59 = vsel %vm205_vm0, %v306_v54, 0  ;;  %v296_v60 = vmul.f32 %v594_v56, %v809_v29 }
  0xce   : > { %v596_v22 = vpop.eup %595  ;;  %v307_v61 = vpack.c.bf16 %v297_v23, %v296_v60 }
  0xcf   : > { %v598_v62 = vpop.eup %597  ;;  %v299_v4 = vmul.f32 %v596_v22, %v818_v34 }
  0xd0   : > { %513 = vmatpush3.bf16.xpose.msra.mxu0 %v320_v42  ;;  %v329_v63 = vsel %vm205_vm0, %v307_v61, 0  ;;  %v298_v3 = vmul.f32 %v598_v62, %v821_v35 }
  0xd1   : > { %514 = vmatprep.subr.bf16.mxu0 %v669_v48 }
  0xd2   : > { %v600_v5 = vpop.eup %599  ;;  %v308_v28 = vpack.c.bf16 %v299_v4, %v298_v3 }
  0xd3   : > { %v602_v29 = vpop.eup %601  ;;  %v301_v11 = vmul.f32 %v600_v5, %v830_v40  ;;  %v385_v40 = vpop.permute.xlu0 %384 }
  0xd4   : > { %v332_v7 = vsel %vm205_vm0, %v308_v28, 0  ;;  %v300_v10 = vmul.f32 %v602_v29, %v833_v41  ;;  %v380_v41 = vstv %s493_s6 }
  0xd5   : > { %v381_v15 = vadd.s32 %v380_v41, %v379_v14 }
  0xd6   : > { %v309_v35 = vpack.c.bf16 %v301_v11, %v300_v10 }
  0xd7   : > { %vm386_vm2 = vcmp.eq.s32.totalorder %v385_v40, %v381_v15 }
  0xd8   : > { %515 = vmatpush3.bf16.xpose.msra.mxu0 %v323_v51  ;;  %v335_v34 = vsel %vm205_vm0, %v309_v35, 0 }
  0xd9   : > { %516 = vmatprep.subr.bf16.mxu0 %v669_v48 }
  0xe0   : > { %517 = vmatpush3.bf16.xpose.msra.mxu0 %v326_v59 }
  0xe1   : > { %518 = vmatprep.subr.bf16.mxu0 %v669_v48 }
  0xe8   : > { %519 = vmatpush3.bf16.xpose.msra.mxu0 %v329_v63 }
  0xe9   : > { %520 = vmatprep.subr.bf16.mxu0 %v669_v48 }
  0xf0   : > { %521 = vmatpush3.bf16.xpose.msra.mxu0 %v332_v7 }
  0xf1   : > { %522 = vmatprep.subr.bf16.mxu0 %v669_v48 }
  0xf8   : > { %523 = vmatpush3.bf16.xpose.msra.mxu0 %v335_v34 }
  0xff   : > { %525 = vmatmul.mubr.msk.bf16.vlgmr.msra.gmra.mrb[0].mxu0 %vm205_vm0, %v172_v12 }
 0x1d2   : > { %v371_v18 = vpop.f32.mrb[0].mxu0 }
 0x1d3   : > { %v526_v48 = vpop.f32.mrb[1].mxu0  ;;  %v387_v19 = vsel %vm386_vm2, %v371_v18, 0.0 }
 0x1d4   : > { %v374_v20 = vpop.f32.mrb[2].mxu0  ;;  %388 = vadd.xlane.f32.xlu1 %v387_v19 }
 0x1d5   : > { %v527_v21 = vpop.f32.mrb[3].mxu0 }
 0x261   : > { %v389_v24 = vpop.xlane.xlu1 %388 }
 0x262   : > { %v390_v0 = vmul.f32 %v389_v24, %v389_v24  ;;  %v401_v6 = vmul.f32 0.87758255, %v389_v24  ;;  %v494_v37 = vadd.f32 -0.23971277, %v389_v24  ;;  %vm404_vm5 = vcmp.gt.f32.partialorder %v389_v24, -0.87758255 }
 0x264   : > { %v391_v25 = vsub.f32 1.0, %v390_v0 }
 0x266   : > { %v392_v2 = vmax.f32 %v391_v25, 0.0 }
 0x268   : > { %v393_v26 = vmin.f32 %v392_v2, 1.0 }
 0x26a   : > { %603 = vrsqrt.f32 %v393_v26  ;;  %vm396_vm3 = vcmp.eq.f32.partialorder %v393_v26, inf  ;;  %v399_v31 = vand.u32 2147483648, %v393_v26  ;;  %vm398_vm4 = vcmp.eq.f32.partialorder %v393_v26, 0.0 }
 0x274   : > { %v604_v27 = vpop.eup %603 }
 0x275   : > { %v395_v30 = vmul.f32 %v604_v27, %v393_v26 }
 0x277   : > { %v397_v32 = vsel %vm396_vm3, %v393_v26, %v395_v30 }
 0x278   : > { %v400_v1 = vsel %vm398_vm4, %v399_v31, %v397_v32 }
 0x279   : > { %v402_v33 = vmul.f32 0.47942555, %v400_v1 }
 0x27b   : > { %v403_v36 = vsub.f32 %v401_v6, %v402_v33 }
 0x27d   : > { %v406_v38 = vsel %vm404_vm5, %v403_v36, %v494_v37 }
 0x27e   : > { %v407_v39 = vsub.f32 %v406_v38, %v389_v24 }
 0x280   : > { %v408_v42 = vsel %vm386_vm2, %v407_v39, 0.0 }
 0x281   : > { %v409_v9 = vadd.f32 %v408_v42, %v371_v18 }
 0x283   : > { %v410_v8 = vmul.f32 64.0, %v409_v9 }
 0x285   : > { %411 = vst [vmem:[%s164_s9] sm:$0xff] %v410_v8 }
 0x286   : > { %618 = shalt.err (!%p615_p3)
}
 0x287   : > { %s619_s27 = scalar_lea.hbm %s894_s19, 128  ;;  %s623_s30 = scalar_lea.hbm %s939_s3, 256 }
 0x288   : > { %p620_p4 = scmp.ne.s32.totalorder %s894_s19, %s619_s27  ;;  %p624_p9 = scmp.lt.u32.totalorder %s894_s19, %s939_s3 }
 0x289   : > { %p625_p10 = scmp.lt.u32.totalorder %s623_s30, %s619_s27  ;;  %p627_p12 = scmp.lt.u32.totalorder %s619_s27, %s894_s19 }
 0x28a   : > { %p621_p7 = pnand %p620_p4, %p731_p5 }
 0x28b   : > { %p626_p11 = por %p625_p10, %p624_p9 }
 0x28c   : > { %p622_p8 = pneg %p621_p7 }
 0x28d   : > { %p628_p13 = por %p627_p12, %p626_p11 }
 0x28f   : > { %p629_p0 = pnand %p628_p13, %p622_p8 }
 0x291   : > { %632 = shalt.err (!%p629_p0)
}
 0x292   : > { %528 = dma.vmem_to_hbm [thread:$0]  (%p731_p5), %s896_s10, 128, %s894_s19, %s413_s20  }
 0x293 PF: > { %p534_p1 = scmp.ge.s32.totalorder %s667_s15, 2  ;;  %s438_s6 = sand.u32 1, %s655_s12  }
 0x294   : > { %s439_s7 = scalar_lea.sflag [#allocation3], %s438_s6 }
 0x295   : > { %p531_p2 = pnand %p534_p1, %p735_p6 }
 0x297   : > { %650 = dma.done.wait (!%p531_p2), %s439_s7, 128  }
 0x298   : > { %652 = vsyncadd (!%p531_p2), %s439_s7, 4294967168  ;;  %p13_p3 = scmp.ge.s32.totalorder %s718_s18, 4   ;;  %s942_s12 = smov %s659_s13 }
 0x299   : > { %s943_s13 = smov %s663_s14  ;;  %s944_s14 = smov %s729_s21 }
 0x29a   : > { %s945_s15 = smov %s718_s18  ;;  %15 = sbr.rel (!%p13_p3) target bundleno = 3 (0x3), region = 67 }
 0x2a1   :  { %444 = vsyncpa [#allocation3], 1 }
 0x2a2   :  { %446 = vsyncpa [#allocation3 + $0x1], 1 }

</bundles_post_ra>
